<compile_context>
chip_gen: v6e
topology: v6e:2x2x1
jax: 0.10.0
libtpu: 0.0.40
codegen_flags: <defaults>
</compile_context>

<pallas_src>
import jax
import jax.numpy as jnp
from jax import lax
from jax.experimental import pallas as pl
from jax.experimental.pallas import tpu as pltpu


# ---------------------------------------------------------------------------
# Prologue: per-column L2 normalization of BOTH weight matrices, one call,
# column-tiled (independent along d_out), bf16 output.
# ---------------------------------------------------------------------------
def _normalize_pair_kernel(w1_ref, w2_ref, o1_ref, o2_ref):
    eps = jnp.float32(1e-12)          # F.normalize default eps (clamps the norm)
    eps_sq = eps * eps                # representable in f32 (>= min normal)
    for w_ref, o_ref in ((w1_ref, o1_ref), (w2_ref, o2_ref)):
        w = w_ref[...].astype(jnp.float32)
        sumsq = jnp.sum(w * w, axis=0, keepdims=True)
        inv = lax.rsqrt(jnp.maximum(sumsq, eps_sq))   # == 1 / max(norm, eps)
        o_ref[...] = (w * inv).astype(o_ref.dtype)


def normalize_weights(w1, w2, *, tn=512, out_dtype=jnp.bfloat16):
    """L2-normalize columns (dim=0) of w1 and w2; returns (w1n, w2n) in bf16.

    Column-tiled so the f32 input blocks never need the whole D x D matrix in
    VMEM (matters for large D on v7x's 64 MiB VMEM), and the f32 read / bf16
    write are pipelined by BlockSpec.  Callers doing repeated inference should
    call this once and pass the result via `normalized_weights=`.
    """
    d_in, d_out = w1.shape
    assert w2.shape == (d_out, d_out)
    tn = d_out if d_out <= tn else tn          # tn stays a multiple of 128 when tiling
    grid = (pl.cdiv(d_out, tn),)
    return pl.pallas_call(
        _normalize_pair_kernel,
        out_shape=(
            jax.ShapeDtypeStruct((d_in, d_out), out_dtype),
            jax.ShapeDtypeStruct((d_out, d_out), out_dtype),
        ),
        grid=grid,
        in_specs=[
            pl.BlockSpec((d_in, tn), lambda j: (0, j)),
            pl.BlockSpec((d_out, tn), lambda j: (0, j)),
        ],
        out_specs=(
            pl.BlockSpec((d_in, tn), lambda j: (0, j)),
            pl.BlockSpec((d_out, tn), lambda j: (0, j)),
        ),
        compiler_params=pltpu.CompilerParams(
            dimension_semantics=("parallel",),
        ),
    )(w1, w2)


# ---------------------------------------------------------------------------
# Main kernel: one (tm, D) row tile per grid step.
# ---------------------------------------------------------------------------
def _wrb_tile_kernel(alpha_ref, x_ref, w1n_ref, w2n_ref, o_ref):
    xv = x_ref[...]
    x_f32 = xv.astype(jnp.float32)          # residual math in f32
    x_bf = xv.astype(jnp.bfloat16)          # MXU operand dtype

    # fc1 -> relu   (bf16 MXU operands, f32 accumulation)
    h = jnp.dot(x_bf, w1n_ref[...], preferred_element_type=jnp.float32)
    h = jnp.maximum(h, 0.0)

    # dropout == identity in eval mode

    # fc2 -> relu
    out = jnp.dot(h.astype(jnp.bfloat16), w2n_ref[...],
                  preferred_element_type=jnp.float32)
    out = jnp.maximum(out, 0.0)

    # Gated residual with the RAW alpha parameter (unused-sigmoid quirk of the
    # PyTorch source).  FMA form saves one full-tile multiply.
    a = alpha_ref[0]
    o_ref[...] = (x_f32 + a * (out - x_f32)).astype(o_ref.dtype)


def weighted_residual_block(x, w1, w2, alpha, *, tm=2048,
                            normalized_weights=None, donate_x=False):
    """x: [M, D] (f32 or bf16; bf16 halves activation HBM traffic),
    w1/w2: [D, D] float32 (PyTorch [in_dim, out_dim] layout; forward is
    matmul(x, normalize(W, dim=0))), alpha: scalar float32 (RAW, not sigmoid).

    normalized_weights: optional (w1n, w2n) bf16 pair from normalize_weights()
    to skip the per-call normalization prologue (steady-state serving).
    donate_x: alias x's HBM buffer to the output (only if caller drops x).
    """
    M, D = x.shape
    assert w1.shape == (D, D) and w2.shape == (D, D), "residual needs in==out dims"
    alpha_arr = jnp.asarray(alpha, jnp.float32).reshape(1)

    if normalized_weights is None:
        w1n, w2n = normalize_weights(w1, w2)
    else:
        w1n, w2n = normalized_weights

    # Tall row tiles amortize per-step overhead (HBM-bound at small D); a
    # full-array block is always legal when M is small.  Partial trailing
    # blocks are masked on write and rows are independent, so cdiv tiling is
    # safe for any M.
    if tm >= M:
        tm = M
    else:
        tm = max(8, (tm // 8) * 8)          # keep sublane-aligned tiles
    grid = (pl.cdiv(M, tm),)

    io_aliases = {1: 0} if donate_x else {}

    return pl.pallas_call(
        _wrb_tile_kernel,
        out_shape=jax.ShapeDtypeStruct((M, D), x.dtype),
        grid=grid,
        in_specs=[
            # scalar gate in SMEM
            pl.BlockSpec((1,), lambda i: (0,), memory_space=pltpu.MemorySpace.SMEM),
            # x row tile, pipelined over the grid
            pl.BlockSpec((tm, D), lambda i: (i, 0)),
            # normalized bf16 weights: constant index map -> VMEM-resident
            pl.BlockSpec((D, D), lambda i: (0, 0)),
            pl.BlockSpec((D, D), lambda i: (0, 0)),
        ],
        out_specs=pl.BlockSpec((tm, D), lambda i: (i, 0)),
        input_output_aliases=io_aliases,
        compiler_params=pltpu.CompilerParams(
            dimension_semantics=("parallel",),   # row tiles are independent
            vmem_limit_bytes=64 * 1024 * 1024,   # <= physical on v5e/v6e/v7x
        ),
    )(alpha_arr, x, w1n, w2n)


# ---------------------------------------------------------------------------
# Pure-JAX reference (f32 everywhere) and self-test.
# ---------------------------------------------------------------------------
def _reference(x, w1, w2, alpha):
    eps = 1e-12
    w1n = w1 / jnp.maximum(jnp.linalg.norm(w1, axis=0, keepdims=True), eps)
    w2n = w2 / jnp.maximum(jnp.linalg.norm(w2, axis=0, keepdims=True), eps)
    out = jnp.maximum(x @ w1n, 0.0)
    out = jnp.maximum(out @ w2n, 0.0)
    return (1.0 - alpha) * x + alpha * out


if __name__ == "__main__":
    key = jax.random.PRNGKey(0)
    kx, k1, k2 = jax.random.split(key, 3)

    batch, seq, feat = 2, 8, 128          # in_features == out_features == 128
    M = batch * seq

    x = jax.random.normal(kx, (M, feat), dtype=jnp.float32)

    # Deterministic synthetic parameters (xavier-uniform-like scale for shape
    # [in_dim, out_dim]); exact init values are not checkpoint-loaded.
    gain = jnp.sqrt(2.0)                   # calculate_gain('relu')
    bound = gain * jnp.sqrt(6.0 / (feat + feat))
    w1 = jax.random.uniform(k1, (feat, feat), jnp.float32, -bound, bound)
    w2 = jax.random.uniform(k2, (feat, feat), jnp.float32, -bound, bound)

    # Module init sets alpha = 0.0 (output would equal x); use a nonzero value
    # so the residual mixing path is actually exercised.
    alpha = jnp.float32(0.3)

    # Steady-state serving path: normalize weights once (one pallas_call for
    # BOTH weights), drive the block with bf16 activations.
    w1n, w2n = normalize_weights(w1, w2)
    x_bf16 = x.astype(jnp.bfloat16)

    y = jax.block_until_ready(
        weighted_residual_block(x_bf16, w1, w2, alpha,
                                normalized_weights=(w1n, w2n)))

    # Also exercise the self-contained path (prologue fused into the call).
    y_f32 = jax.block_until_ready(weighted_residual_block(x, w1, w2, alpha))

    y_ref = _reference(x, w1, w2, alpha)

    # Tolerance covers bf16 weights + bf16 activation I/O (f32 accumulation).
    assert jnp.allclose(y.astype(jnp.float32), y_ref, atol=5e-2, rtol=5e-2), \
        "bf16-I/O path mismatch vs reference"
    assert jnp.allclose(y_f32, y_ref, atol=5e-2, rtol=5e-2), \
        "f32-I/O path mismatch vs reference"

    print("KERNEL_OK")
</pallas_src>

<mosaic_0001>
module attributes {stable_mosaic.version = 11 : i64} {
  func.func @_normalize_pair_kernel(%arg0: i32, %arg1: memref<128x128xf32, #tpu.memory_space<vmem>>, %arg2: memref<128x128xf32, #tpu.memory_space<vmem>>, %arg3: memref<128x128xbf16, #tpu.memory_space<vmem>>, %arg4: memref<128x128xbf16, #tpu.memory_space<vmem>>) attributes {dimension_semantics = [#tpu.dimension_semantics<parallel>], iteration_bounds = array<i64: 1>, scalar_prefetch = 0 : i64, scratch_operands = 0 : i64, tpu.core_type = #tpu.core_type<tc>, window_params = [{transform_indices = @transform_0, window_bounds = array<i64: 128, 128>}, {transform_indices = @transform_1, window_bounds = array<i64: 128, 128>}, {transform_indices = @transform_2, window_bounds = array<i64: 128, 128>}, {transform_indices = @transform_3, window_bounds = array<i64: 128, 128>}]} {
    %cst = arith.constant 9.99999996E-13 : f32
    %cst_0 = arith.constant 9.99999996E-13 : f32
    %0 = arith.mulf %cst, %cst_0 : f32
    %c0 = arith.constant 0 : index
    %c0_1 = arith.constant 0 : index
    %1 = vector.load %arg1[%c0, %c0_1] : memref<128x128xf32, #tpu.memory_space<vmem>>, vector<128x128xf32>
    %2 = arith.mulf %1, %1 : vector<128x128xf32>
    %cst_2 = arith.constant dense<0.000000e+00> : vector<128xf32>
    %3 = vector.multi_reduction <add>, %2, %cst_2 [0] : vector<128x128xf32> to vector<128xf32>
    %4 = vector.shape_cast %3 : vector<128xf32> to vector<1x128xf32>
    %5 = vector.broadcast %0 : f32 to vector<1x128xf32>
    %6 = arith.maximumf %4, %5 : vector<1x128xf32>
    %7 = math.rsqrt %6 : vector<1x128xf32>
    %8 = vector.broadcast %7 : vector<1x128xf32> to vector<128x128xf32>
    %9 = arith.mulf %1, %8 : vector<128x128xf32>
    %10 = arith.truncf %9 : vector<128x128xf32> to vector<128x128xbf16>
    %c0_3 = arith.constant 0 : index
    %c0_4 = arith.constant 0 : index
    %11 = vector.load %arg3[%c0_3, %c0_4] : memref<128x128xbf16, #tpu.memory_space<vmem>>, vector<128x128xbf16>
    tpu.vector_store %arg3[%c0_3, %c0_4], %10 {strides = array<i32>} : memref<128x128xbf16, #tpu.memory_space<vmem>>, vector<128x128xbf16>,
    %c0_5 = arith.constant 0 : index
    %c0_6 = arith.constant 0 : index
    %12 = vector.load %arg2[%c0_5, %c0_6] : memref<128x128xf32, #tpu.memory_space<vmem>>, vector<128x128xf32>
    %13 = arith.mulf %12, %12 : vector<128x128xf32>
    %cst_7 = arith.constant dense<0.000000e+00> : vector<128xf32>
    %14 = vector.multi_reduction <add>, %13, %cst_7 [0] : vector<128x128xf32> to vector<128xf32>
    %15 = vector.shape_cast %14 : vector<128xf32> to vector<1x128xf32>
    %16 = vector.broadcast %0 : f32 to vector<1x128xf32>
    %17 = arith.maximumf %15, %16 : vector<1x128xf32>
    %18 = math.rsqrt %17 : vector<1x128xf32>
    %19 = vector.broadcast %18 : vector<1x128xf32> to vector<128x128xf32>
    %20 = arith.mulf %12, %19 : vector<128x128xf32>
    %21 = arith.truncf %20 : vector<128x128xf32> to vector<128x128xbf16>
    %c0_8 = arith.constant 0 : index
    %c0_9 = arith.constant 0 : index
    %22 = vector.load %arg4[%c0_8, %c0_9] : memref<128x128xbf16, #tpu.memory_space<vmem>>, vector<128x128xbf16>
    tpu.vector_store %arg4[%c0_8, %c0_9], %21 {strides = array<i32>} : memref<128x128xbf16, #tpu.memory_space<vmem>>, vector<128x128xbf16>,
    return
  }
  func.func @transform_0(%arg0: i32) -> (i32, i32) {
    %c0_i32 = arith.constant 0 : i32
    %c0_i32_0 = arith.constant 0 : i32
    return %c0_i32, %arg0 : i32, i32
  }
  func.func @transform_1(%arg0: i32) -> (i32, i32) {
    %c0_i32 = arith.constant 0 : i32
    %c0_i32_0 = arith.constant 0 : i32
    return %c0_i32, %arg0 : i32, i32
  }
  func.func @transform_2(%arg0: i32) -> (i32, i32) {
    %c0_i32 = arith.constant 0 : i32
    %c0_i32_0 = arith.constant 0 : i32
    return %c0_i32, %arg0 : i32, i32
  }
  func.func @transform_3(%arg0: i32) -> (i32, i32) {
    %c0_i32 = arith.constant 0 : i32
    %c0_i32_0 = arith.constant 0 : i32
    return %c0_i32, %arg0 : i32, i32
  }
}

</mosaic_0001>

<bundles_post_ra>
// kernel: tpu_custom_call.1
= control target key start
LH: loop header
LB: loop body
LE: loop exit
PB: predicated region body
PF: predicated region fallthrough
CT: control target
= control target key end

     0   :  { %9 = vsyncpa [#allocation3], 0  ;;  %s844_s0 = inlined_call_operand.hbm [shape: f32[128,128], index: 0, kind: input, shape index: {}]   ;;  %s845_s1 = inlined_call_operand.hbm [shape: f32[128,128], index: 1, kind: input, shape index: {}]   ;;  %s846_s2 = inlined_call_operand.hbm [shape: bf16[128,128], index: 2, kind: output, shape index: {0}]   ;;  %s847_s3 = inlined_call_operand.hbm [shape: bf16[128,128], index: 3, kind: output, shape index: {1}]  }
   0x1   :  { %10 = vsyncpa [#allocation6], 0 }
   0x2   :  { %11 = vsyncpa [#allocation4], 0 }
   0x3   :  { %12 = vsyncpa [#allocation9], 0  ;;  %s637_s12 = smov [#allocation2]  }
   0x4   :  { %s18_s13 = sshll.u32 %s637_s12, 4  ;;  %s19_s13 = int_to_ptr.vmem [resolvable:$true] %s18_s13 }
   0x5   :  { %s557_s14 = scalar_lea.vmem %s19_s13, 2048  ;;  %p562_p1 = scmp.lt.s32.totalorder %s19_s13, %s19_s13 }
   0x6   :  { %p558_p0 = scmp.ne.s32.totalorder %s19_s13, %s557_s14  ;;  %p563_p2 = scmp.lt.s32.totalorder %s557_s14, %s557_s14 }
   0x8   :  { %p564_p3 = por %p563_p2, %p562_p1 }
   0xa   :  { %p565_p4 = pnand %p564_p3, %p558_p0 }
   0xc   :  { %568 = shalt.err (!%p565_p4)
}
   0xd   :  { %s638_s15 = smov 128   ;;  %s639_s16 = smov 8  }
   0xe   :  { %24 = dma.hbm_to_vmem [thread:$0]  %s844_s0, 2048, %s19_s13, [#allocation3], %s638_s15, %s638_s15, %s639_s16  }
   0xf   :  { %s640_s19 = smov [#allocation5]  }
  0x10   :  { %s30_s20 = sshll.u32 %s640_s19, 4  ;;  %s31_s20 = int_to_ptr.vmem [resolvable:$true] %s30_s20 }
  0x11   :  { %s577_s21 = scalar_lea.vmem %s31_s20, 2048  ;;  %p582_p6 = scmp.lt.s32.totalorder %s31_s20, %s31_s20 }
  0x12   :  { %p578_p5 = scmp.ne.s32.totalorder %s31_s20, %s577_s21  ;;  %p583_p7 = scmp.lt.s32.totalorder %s577_s21, %s577_s21 }
  0x14   :  { %p584_p8 = por %p583_p7, %p582_p6 }
  0x16   :  { %p585_p9 = pnand %p584_p8, %p578_p5 }
  0x18   :  { %588 = shalt.err (!%p585_p9)
}
  0x19   :  { %36 = dma.hbm_to_vmem [thread:$0]  %s845_s1, 2048, %s31_s20, [#allocation6], %s638_s15, %s638_s15, %s639_s16  }
  0x1a   :  { %629 = dma.done.wait [#allocation3], 2048  }
  0x1b   :  { %630 = vsyncadd [#allocation3], 4294965248 }
  0x1c   :  { %631 = dma.done.wait [#allocation6], 2048  }
  0x1d   :  { %632 = vsyncadd [#allocation6], 4294965248  ;;  %v671_v0 = vld [vmem:[#allocation2] sm:$0xff]  ;;  %v673_v1 = vld [vmem:[#allocation2 + $0x8] sm:$0xff]  ;;  %s641_s0 = smov [#allocation7]   ;;  %s642_s24 = smov [#allocation8]  }
  0x1e   :  { %v675_v2 = vld [vmem:[#allocation2 + $0x10] sm:$0xff]  ;;  %v677_v3 = vld [vmem:[#allocation2 + $0x18] sm:$0xff]  ;;  %v59_v4 = vmul.f32 %v671_v0, %v671_v0  ;;  %v60_v5 = vmul.f32 %v673_v1, %v673_v1  ;;  %v685_v7 = vld [vmem:[#allocation2 + $0x20] sm:$0xff]  ;;  %s350_s1 = sshll.u32 %s641_s0, 4  ;;  %s362_s25 = sshll.u32 %s642_s24, 4  ;;  %s822_s1 = int_to_ptr.vmem [resolvable:$true] %s350_s1  ;;  %s363_s25 = int_to_ptr.vmem [resolvable:$true] %s362_s25 }
  0x1f   :  { %v61_v6 = vmul.f32 %v675_v2, %v675_v2  ;;  %v62_v8 = vmul.f32 %v677_v3, %v677_v3  ;;  %v689_v10 = vld [vmem:[#allocation2 + $0x28] sm:$0xff]  ;;  %v63_v11 = vmul.f32 %v685_v7, %v685_v7  ;;  %v693_v13 = vld [vmem:[#allocation5] sm:$0xff]  ;;  %v697_v15 = vld [vmem:[#allocation2 + $0x30] sm:$0xff]  ;;  %s589_s26 = scalar_lea.vmem %s822_s1, 1024  ;;  %p594_p11 = scmp.lt.s32.totalorder %s822_s1, %s822_s1 }
  0x20   :  { %v75_v9 = vadd.f32 %v60_v5, %v59_v4  ;;  %v695_v14 = vld [vmem:[#allocation5 + $0x8] sm:$0xff]  ;;  %v699_v16 = vld [vmem:[#allocation5 + $0x10] sm:$0xff]  ;;  %v701_v17 = vld [vmem:[#allocation5 + $0x18] sm:$0xff]  ;;  %v210_v18 = vmul.f32 %v693_v13, %v693_v13  ;;  %v64_v20 = vmul.f32 %v689_v10, %v689_v10  ;;  %v65_v27 = vmul.f32 %v697_v15, %v697_v15  ;;  %p590_p10 = scmp.ne.s32.totalorder %s822_s1, %s589_s26  ;;  %p595_p12 = scmp.lt.s32.totalorder %s589_s26, %s589_s26 }
  0x21   :  { %v211_v19 = vmul.f32 %v695_v14, %v695_v14  ;;  %v709_v22 = vld [vmem:[#allocation5 + $0x20] sm:$0xff]  ;;  %v212_v23 = vmul.f32 %v699_v16, %v699_v16  ;;  %v713_v24 = vld [vmem:[#allocation2 + $0x38] sm:$0xff]  ;;  %v213_v25 = vmul.f32 %v701_v17, %v701_v17  ;;  %v719_v29 = vld [vmem:[#allocation5 + $0x28] sm:$0xff] }
  0x22   :  { %v76_v12 = vadd.f32 %v75_v9, %v61_v6  ;;  %v721_v30 = vld [vmem:[#allocation2 + $0x40] sm:$0xff]  ;;  %v214_v31 = vmul.f32 %v709_v22, %v709_v22  ;;  %v66_v33 = vmul.f32 %v713_v24, %v713_v24  ;;  %v727_v35 = vld [vmem:[#allocation5 + $0x30] sm:$0xff]  ;;  %v729_v36 = vld [vmem:[#allocation2 + $0x48] sm:$0xff]  ;;  %v215_v37 = vmul.f32 %v719_v29, %v719_v29  ;;  %p596_p13 = por %p595_p12, %p594_p11 }
  0x23   :  { %v226_v26 = vadd.f32 %v211_v19, %v210_v18  ;;  %v67_v39 = vmul.f32 %v721_v30, %v721_v30  ;;  %v735_v41 = vld [vmem:[#allocation5 + $0x38] sm:$0xff]  ;;  %v737_v42 = vld [vmem:[#allocation2 + $0x50] sm:$0xff]  ;;  %v216_v43 = vmul.f32 %v727_v35, %v727_v35  ;;  %v68_v45 = vmul.f32 %v729_v36, %v729_v36  ;;  %v743_v47 = vld [vmem:[#allocation5 + $0x40] sm:$0xff] }
  0x24   :  { %v77_v21 = vadd.f32 %v76_v12, %v62_v8  ;;  %v745_v48 = vld [vmem:[#allocation2 + $0x58] sm:$0xff]  ;;  %v217_v49 = vmul.f32 %v735_v41, %v735_v41  ;;  %v69_v51 = vmul.f32 %v737_v42, %v737_v42  ;;  %v751_v53 = vld [vmem:[#allocation5 + $0x48] sm:$0xff]  ;;  %v753_v54 = vld [vmem:[#allocation2 + $0x60] sm:$0xff]  ;;  %v218_v55 = vmul.f32 %v743_v47, %v743_v47  ;;  %p597_p0 = pnand %p596_p13, %p590_p10 }
  0x25   :  { %v227_v32 = vadd.f32 %v226_v26, %v212_v23  ;;  %v70_v57 = vmul.f32 %v745_v48, %v745_v48  ;;  %v759_v59 = vld [vmem:[#allocation5 + $0x50] sm:$0xff]  ;;  %v761_v60 = vld [vmem:[#allocation2 + $0x68] sm:$0xff]  ;;  %v219_v61 = vmul.f32 %v751_v53, %v751_v53  ;;  %v71_v63 = vmul.f32 %v753_v54, %v753_v54  ;;  %v767_v5 = vld [vmem:[#allocation5 + $0x58] sm:$0xff] }
  0x26   :  { %v78_v28 = vadd.f32 %v77_v21, %v63_v11  ;;  %v769_v6 = vld [vmem:[#allocation2 + $0x70] sm:$0xff]  ;;  %v220_v8 = vmul.f32 %v759_v59, %v759_v59  ;;  %v72_v11 = vmul.f32 %v761_v60, %v761_v60  ;;  %v775_v18 = vld [vmem:[#allocation5 + $0x60] sm:$0xff]  ;;  %v777_v19 = vld [vmem:[#allocation2 + $0x78] sm:$0xff] }
  0x27   :  { %v228_v38 = vadd.f32 %v227_v32, %v213_v25  ;;  %v73_v23 = vmul.f32 %v769_v6, %v769_v6  ;;  %v783_v26 = vld [vmem:[#allocation5 + $0x68] sm:$0xff] }
  0x28   :  { %v79_v34 = vadd.f32 %v78_v28, %v64_v20  ;;  %v221_v20 = vmul.f32 %v767_v5, %v767_v5 }
  0x29   :  { %v229_v44 = vadd.f32 %v228_v38, %v214_v31  ;;  %v74_v31 = vmul.f32 %v777_v19, %v777_v19 }
  0x2a   :  { %v80_v40 = vadd.f32 %v79_v34, %v65_v27  ;;  %v222_v27 = vmul.f32 %v775_v18, %v775_v18  ;;  %v223_v34 = vmul.f32 %v783_v26, %v783_v26 }
  0x2b   :  { %v230_v50 = vadd.f32 %v229_v44, %v215_v37 }
  0x2c   :  { %v81_v46 = vadd.f32 %v80_v40, %v66_v33  ;;  %v789_v33 = vld [vmem:[#allocation5 + $0x70] sm:$0xff] }
  0x2d   :  { %v231_v56 = vadd.f32 %v230_v50, %v216_v43  ;;  %v224_v40 = vmul.f32 %v789_v33, %v789_v33 }
  0x2e   :  { %v82_v52 = vadd.f32 %v81_v46, %v67_v39  ;;  %v793_v39 = vld [vmem:[#allocation5 + $0x78] sm:$0xff] }
  0x2f   :  { %v232_v62 = vadd.f32 %v231_v56, %v217_v49 }
  0x30   :  { %v83_v58 = vadd.f32 %v82_v52, %v68_v45  ;;  %v225_v45 = vmul.f32 %v793_v39, %v793_v39 }
  0x31   :  { %v233_v9 = vadd.f32 %v232_v62, %v218_v55 }
  0x32   :  { %v84_v4 = vadd.f32 %v83_v58, %v69_v51 }
  0x33   :  { %v234_v21 = vadd.f32 %v233_v9, %v219_v61 }
  0x34   :  { %v85_v12 = vadd.f32 %v84_v4, %v70_v57 }
  0x35   :  { %v235_v28 = vadd.f32 %v234_v21, %v220_v8 }
  0x36   :  { %v86_v25 = vadd.f32 %v85_v12, %v71_v63 }
  0x37   :  { %v236_v37 = vadd.f32 %v235_v28, %v221_v20 }
  0x38   :  { %v87_v32 = vadd.f32 %v86_v25, %v72_v11 }
  0x39   :  { %v237_v43 = vadd.f32 %v236_v37, %v222_v27 }
  0x3a   :  { %v88_v38 = vadd.f32 %v87_v32, %v73_v23 }
  0x3b   :  { %v238_v46 = vadd.f32 %v237_v43, %v223_v34 }
  0x3c   :  { %v89_v44 = vadd.f32 %v88_v38, %v74_v31 }
  0x3d   :  { %v239_v50 = vadd.f32 %v238_v46, %v224_v40 }
  0x3e   :  { %v90_v49 = vrot.slane %v89_v44, 4 }
  0x3f   :  { %v240_v52 = vadd.f32 %v239_v50, %v225_v45 }
  0x40   :  { %v91_v51 = vadd.f32 %v90_v49, %v89_v44 }
  0x41   :  { %v241_v56 = vrot.slane %v240_v52, 4 }
  0x42   :  { %v92_v55 = vrot.slane %v91_v51, 2 }
  0x43   :  { %v242_v58 = vadd.f32 %v241_v56, %v240_v52 }
  0x44   :  { %v93_v57 = vadd.f32 %v92_v55, %v91_v51 }
  0x45   :  { %v243_v62 = vrot.slane %v242_v58, 2 }
  0x46   :  { %v94_v61 = vrot.slane %v93_v57, 1 }
  0x47   :  { %v244_v4 = vadd.f32 %v243_v62, %v242_v58 }
  0x48   :  { %v95_v63 = vadd.f32 %v94_v61, %v93_v57 }
  0x49   :  { %v245_v9 = vrot.slane %v244_v4, 1 }
  0x4a   :  { %v96_v8 = vmax.f32 %v95_v63, 1e-24 }
  0x4b   :  { %v246_v11 = vadd.f32 %v245_v9, %v244_v4 }
  0x4c   :  { %545 = vrsqrt.f32 %v96_v8 }
  0x4d   :  { %v247_v12 = vmax.f32 %v246_v11, 1e-24 }
  0x4f   :  { %547 = vrsqrt.f32 %v247_v12 }
  0x59   :  { %v546_v20 = vpop.eup %545 }
  0x5a   :  { %v98_v21 = vmul.f32 %v546_v20, %v671_v0  ;;  %v99_v23 = vmul.f32 %v546_v20, %v673_v1  ;;  %v100_v25 = vmul.f32 %v546_v20, %v675_v2  ;;  %v101_v27 = vmul.f32 %v546_v20, %v677_v3 }
  0x5b   :  { %v102_v28 = vmul.f32 %v546_v20, %v685_v7  ;;  %v103_v31 = vmul.f32 %v546_v20, %v689_v10  ;;  %v104_v32 = vmul.f32 %v546_v20, %v697_v15  ;;  %v105_v34 = vmul.f32 %v546_v20, %v713_v24 }
  0x5c   :  { %v446_v37 = vpack.c.bf16 %v99_v23, %v98_v21  ;;  %v451_v38 = vpack.c.bf16 %v101_v27, %v100_v25  ;;  %v106_v40 = vmul.f32 %v546_v20, %v721_v30  ;;  %v107_v0 = vmul.f32 %v546_v20, %v729_v36  ;;  %v548_v44 = vpop.eup %547 }
  0x5d   :  { %v456_v43 = vpack.c.bf16 %v103_v31, %v102_v28  ;;  %v461_v1 = vpack.c.bf16 %v105_v34, %v104_v32  ;;  %v108_v2 = vmul.f32 %v546_v20, %v737_v42  ;;  %v109_v3 = vmul.f32 %v546_v20, %v745_v48 }
  0x5e   :  { %447 = vst [vmem:[#allocation7] sm:$0xff] %v446_v37   ;;  %523 = vst [vmem:[#allocation7 + $0x8] sm:$0xff] %v451_v38   ;;  %v466_v7 = vpack.c.bf16 %v107_v0, %v106_v40  ;;  %v110_v10 = vmul.f32 %v546_v20, %v753_v54  ;;  %v111_v15 = vmul.f32 %v546_v20, %v761_v60 }
  0x5f   :  { %v112_v24 = vmul.f32 %v546_v20, %v769_v6  ;;  %524 = vst [vmem:[#allocation7 + $0x10] sm:$0xff] %v456_v43   ;;  %525 = vst [vmem:[#allocation7 + $0x18] sm:$0xff] %v461_v1   ;;  %v471_v30 = vpack.c.bf16 %v109_v3, %v108_v2  ;;  %v113_v36 = vmul.f32 %v546_v20, %v777_v19 }
  0x60   :  { %v249_v42 = vmul.f32 %v548_v44, %v693_v13  ;;  %v250_v48 = vmul.f32 %v548_v44, %v695_v14  ;;  %526 = vst [vmem:[#allocation7 + $0x20] sm:$0xff] %v466_v7   ;;  %v476_v45 = vpack.c.bf16 %v111_v15, %v110_v10  ;;  %v251_v46 = vmul.f32 %v548_v44, %v699_v16 }
  0x61   :  { %v252_v54 = vmul.f32 %v548_v44, %v701_v17  ;;  %v253_v60 = vmul.f32 %v548_v44, %v709_v22  ;;  %527 = vst [vmem:[#allocation7 + $0x28] sm:$0xff] %v471_v30   ;;  %v481_v6 = vpack.c.bf16 %v113_v36, %v112_v24  ;;  %v254_v50 = vmul.f32 %v548_v44, %v719_v29 }
  0x62   :  { %v486_v49 = vpack.c.bf16 %v250_v48, %v249_v42  ;;  %v255_v51 = vmul.f32 %v548_v44, %v727_v35  ;;  %528 = vst [vmem:[#allocation7 + $0x30] sm:$0xff] %v476_v45   ;;  %v256_v14 = vmul.f32 %v548_v44, %v735_v41  ;;  %v257_v16 = vmul.f32 %v548_v44, %v743_v47 }
  0x63   :  { %v491_v13 = vpack.c.bf16 %v252_v54, %v251_v46  ;;  %v258_v17 = vmul.f32 %v548_v44, %v751_v53  ;;  %529 = vst [vmem:[#allocation7 + $0x38] sm:$0xff] %v481_v6   ;;  %v496_v22 = vpack.c.bf16 %v254_v50, %v253_v60  ;;  %v259_v29 = vmul.f32 %v548_v44, %v759_v59 }
  0x64   :  { %487 = vst [vmem:[#allocation8] sm:$0xff] %v486_v49   ;;  %v260_v35 = vmul.f32 %v548_v44, %v767_v5  ;;  %v261_v19 = vmul.f32 %v548_v44, %v775_v18  ;;  %v501_v41 = vpack.c.bf16 %v256_v14, %v255_v51  ;;  %v262_v47 = vmul.f32 %v548_v44, %v783_v26 }
  0x65   :  { %530 = vst [vmem:[#allocation8 + $0x8] sm:$0xff] %v491_v13   ;;  %v506_v52 = vpack.c.bf16 %v258_v17, %v257_v16  ;;  %v263_v55 = vmul.f32 %v548_v44, %v789_v33 }
  0x66   :  { %600 = shalt.err (!%p597_p0)
}
  0x67   :  { %s643_s27 = smov 64   ;;  %s644_s28 = smov 4   ;;  %531 = vst [vmem:[#allocation8 + $0x10] sm:$0xff] %v496_v22   ;;  %v511_v53 = vpack.c.bf16 %v260_v35, %v259_v29  ;;  %v264_v59 = vmul.f32 %v548_v44, %v793_v39  ;;  %532 = vst [vmem:[#allocation8 + $0x18] sm:$0xff] %v501_v41   ;;  %v516_v5 = vpack.c.bf16 %v262_v47, %v261_v19 }
  0x68   :  { %356 = dma.vmem_to_hbm [thread:$0]  %s822_s1, 1024, %s846_s2, [#allocation4], %s643_s27, %s643_s27, %s644_s28   ;;  %533 = vst [vmem:[#allocation8 + $0x20] sm:$0xff] %v506_v52  }
  0x69   :  { %534 = vst [vmem:[#allocation8 + $0x28] sm:$0xff] %v511_v53   ;;  %v521_v18 = vpack.c.bf16 %v264_v59, %v263_v55  ;;  %535 = vst [vmem:[#allocation8 + $0x30] sm:$0xff] %v516_v5   ;;  %s609_s4 = scalar_lea.vmem %s363_s25, 1024  ;;  %p614_p2 = scmp.lt.s32.totalorder %s363_s25, %s363_s25 }
  0x6a   :  { %p610_p1 = scmp.ne.s32.totalorder %s363_s25, %s609_s4  ;;  %p615_p3 = scmp.lt.s32.totalorder %s609_s4, %s609_s4 }
  0x6b   :  { %536 = vst [vmem:[#allocation8 + $0x38] sm:$0xff] %v521_v18  }
  0x6c   :  { %p616_p4 = por %p615_p3, %p614_p2 }
  0x6e   :  { %p617_p5 = pnand %p616_p4, %p610_p1 }
  0x70   :  { %620 = shalt.err (!%p617_p5)
}
  0x71   :  { %368 = dma.vmem_to_hbm [thread:$0]  %s363_s25, 1024, %s847_s3, [#allocation9], %s643_s27, %s643_s27, %s644_s28  }
  0x72   :  { %633 = dma.done.wait [#allocation4], 1024  }
  0x73   :  { %634 = vsyncadd [#allocation4], 4294966272 }
  0x74   :  { %635 = dma.done.wait [#allocation9], 1024  }
  0x75   :  { %636 = vsyncadd [#allocation9], 4294966272 }
  0x76   :  { %375 = vsyncpa [#allocation3], 1 }
  0x77   :  { %376 = vsyncpa [#allocation6], 1 }
  0x78   :  { %377 = vsyncpa [#allocation4], 1 }
  0x79   :  { %378 = vsyncpa [#allocation9], 1 }

</bundles_post_ra>
